<compile_context>
chip_gen: v7x
topology: tpu7x:2x2x1
jax: 0.10.0
libtpu: 0.0.40
codegen_flags: <defaults>
</compile_context>

<pallas_src>
import jax
import jax.numpy as jnp
from jax.experimental import pallas as pl
from jax.experimental.pallas import tpu as pltpu


def _round_up(n, m):
    return ((n + m - 1) // m) * m


def discriminator_rnn_kernel(x_ref, xt_ref, w1a_ref, w1b_ref, b1_ref, w2_ref, b2_ref,
                             out_ref):
    # In-VMEM upcast (free-ish); inputs may stream as bf16 or f32 from HBM.
    x = x_ref[...].astype(jnp.float32)                    # (TB, D)
    xt = xt_ref[...].astype(jnp.float32)                  # (TB, D)

    # Linear(2D -> 4D) on cat([x, x_tild], -1), with W1 pre-split so no lane-dim
    # concatenate is ever materialized:  cat([x, xt]) @ W1 == x @ W1[:D] + xt @ W1[D:]
    h = (jnp.dot(x, w1a_ref[...], preferred_element_type=jnp.float32)
         + jnp.dot(xt, w1b_ref[...], preferred_element_type=jnp.float32)
         + b1_ref[...])                                   # (TB, 4D)
    h = jnp.maximum(h, 0.0)                               # ReLU

    # Dropout(0.5): identity in eval/inference mode.

    # Linear(4D -> 1) as VPU multiply + lane reduction; keepdims keeps the natural
    # (TB, 1) column layout (no sublane->lane relayout needed before the store).
    p = jnp.sum(h * w2_ref[...], axis=-1, keepdims=True)  # (TB, 1)

    out_ref[...] = (p + b2_ref[0]).astype(out_ref.dtype)  # b2 is an SMEM scalar


def discriminator_rnn(x, x_tild, w1_t, b1, w2_t, b2, *, batch_tile=4096):
    """Forward pass of Discriminator_RNN (eval mode).

    x, x_tild : (..., D)  -- leading dims flattened (matches p.view(-1))
    w1_t      : (2D, 4D)  -- transpose of torch Linear(2D, 4D).weight
    b1        : (4D,)
    w2_t      : (4D, 1)   -- transpose of torch Linear(4D, 1).weight
    b2        : (1,)
    returns   : (prod(leading dims),) float32
    """
    D = x.shape[-1]
    H = w1_t.shape[1]                                      # 4 * D

    x2 = x.reshape(-1, D)
    xt2 = x_tild.reshape(-1, D)
    # Stream inputs in their native dtype (f32 or bf16) -- no extra HBM cast pass.
    if x2.dtype != jnp.float32 and x2.dtype != jnp.bfloat16:
        x2 = x2.astype(jnp.float32)
    if xt2.dtype != jnp.float32 and xt2.dtype != jnp.bfloat16:
        xt2 = xt2.astype(jnp.float32)
    B = x2.shape[0]

    # Batch tile: multiple of 8 sublanes; large enough that each grid step streams
    # >= ~0.5 MiB so the fixed per-step overhead is amortized (HBM-bound kernel).
    tb = min(batch_tile, _round_up(B, 8))
    if B < tb:
        # Only tiny batches (< one tile) hit this; padding copy is negligible here.
        pad = tb - B
        x2 = jnp.pad(x2, ((0, pad), (0, 0)))
        xt2 = jnp.pad(xt2, ((0, pad), (0, 0)))
    nblk = -(-x2.shape[0] // tb)
    # Prefer >= 2 grid steps when there is enough work so v7x's two TensorCores
    # both stream (the batch axis is marked "parallel").
    if nblk == 1 and tb >= 2048:
        tb = _round_up((tb + 1) // 2, 8)
        nblk = -(-x2.shape[0] // tb)
    b_out = nblk * tb                                      # ragged last input block is
                                                           # handled by Pallas; padded
                                                           # output rows are discarded.

    # Split W1 in the wrapper so the kernel never concatenates along the lane dim.
    w1a = w1_t[:D].astype(jnp.float32)                     # (D, 4D)
    w1b = w1_t[D:].astype(jnp.float32)                     # (D, 4D)
    b1r = b1.reshape(1, H).astype(jnp.float32)             # (1, 4D)
    w2r = w2_t.reshape(1, H).astype(jnp.float32)           # (1, 4D) row form
    b2r = b2.reshape(1).astype(jnp.float32)                # (1,)  -> SMEM scalar

    in_bytes = x2.dtype.itemsize
    flops = 4 * B * D * H + 3 * B * H
    bytes_accessed = (2 * B * D * in_bytes                 # x, x_tild stream (dominant)
                      + 2 * D * H * 4 + 2 * H * 4 + 4      # resident params
                      + B * 4)                             # output

    out = pl.pallas_call(
        discriminator_rnn_kernel,
        out_shape=jax.ShapeDtypeStruct((b_out, 1), jnp.float32),
        grid=(nblk,),
        in_specs=[
            pl.BlockSpec((tb, D), lambda i: (i, 0)),       # x       (streams over B)
            pl.BlockSpec((tb, D), lambda i: (i, 0)),       # x_tild  (streams over B)
            pl.BlockSpec((D, H), lambda i: (0, 0)),        # w1[:D]  (VMEM-resident)
            pl.BlockSpec((D, H), lambda i: (0, 0)),        # w1[D:]  (VMEM-resident)
            pl.BlockSpec((1, H), lambda i: (0, 0)),        # b1
            pl.BlockSpec((1, H), lambda i: (0, 0)),        # w2 row
            pl.BlockSpec(memory_space=pltpu.MemorySpace.SMEM),  # b2 scalar
        ],
        out_specs=pl.BlockSpec((tb, 1), lambda i: (i, 0)),  # natural column layout
        compiler_params=pltpu.CompilerParams(
            dimension_semantics=("parallel",)),              # shard batch across TCs
        cost_estimate=pl.CostEstimate(
            flops=flops, transcendentals=0, bytes_accessed=bytes_accessed),
    )(x2, xt2, w1a, w1b, b1r, w2r, b2r)

    return out.reshape(-1)[:B]                               # p.view((-1,)) -> (B,)


def xavier_uniform(key, fan_in, fan_out):
    bound = jnp.sqrt(6.0 / (fan_in + fan_out))
    # PyTorch Linear stores weight as (out, in); we return the (in, out) transpose.
    w = jax.random.uniform(key, (fan_out, fan_in), jnp.float32, -bound, bound)
    return w.T


def reference_forward(x, x_tild, w1_t, b1, w2_t, b2):
    x_all = jnp.concatenate([x, x_tild], axis=-1)
    h = jnp.maximum(x_all @ w1_t + b1, 0.0)
    p = h @ w2_t + b2
    return p.reshape((-1,))


if __name__ == "__main__":
    # Small, deterministic example shapes consistent with the module:
    B, D = 4, 16                      # input_size = D = 16; x, x_tild are (B, D) encodings
    key = jax.random.PRNGKey(0)
    kx, kxt, kw1, kb1, kw2, kb2 = jax.random.split(key, 6)

    x = jax.random.normal(kx, (B, D), jnp.float32)
    x_tild = jax.random.normal(kxt, (B, D), jnp.float32)

    # Parameters (deterministic in-script init, xavier_uniform for weights like the module).
    w1_t = xavier_uniform(kw1, 2 * D, 4 * D)               # (2D, 4D)
    w2_t = xavier_uniform(kw2, 4 * D, 1)                   # (4D, 1)
    bnd1 = 1.0 / jnp.sqrt(2.0 * D)
    bnd2 = 1.0 / jnp.sqrt(4.0 * D)
    b1 = jax.random.uniform(kb1, (4 * D,), jnp.float32, -bnd1, bnd1)
    b2 = jax.random.uniform(kb2, (1,), jnp.float32, -bnd2, bnd2)

    out = discriminator_rnn(x, x_tild, w1_t, b1, w2_t, b2)
    out = jax.block_until_ready(out)

    ref = reference_forward(x, x_tild, w1_t, b1, w2_t, b2)
    assert out.shape == (B,), out.shape
    assert jnp.allclose(out, ref, atol=1e-5, rtol=1e-5), (out, ref)

    print("KERNEL_OK")
</pallas_src>

<mosaic_0001>
module attributes {stable_mosaic.version = 11 : i64} {
  func.func @discriminator_rnn_kernel(%arg0: i32, %arg1: memref<8x16xf32, #tpu.memory_space<vmem>>, %arg2: memref<8x16xf32, #tpu.memory_space<vmem>>, %arg3: memref<16x64xf32, #tpu.memory_space<vmem>>, %arg4: memref<16x64xf32, #tpu.memory_space<vmem>>, %arg5: memref<1x64xf32, #tpu.memory_space<vmem>>, %arg6: memref<1x64xf32, #tpu.memory_space<vmem>>, %arg7: memref<1xf32, #tpu.memory_space<smem>>, %arg8: memref<8x1xf32, #tpu.memory_space<vmem>>) attributes {dimension_semantics = [#tpu.dimension_semantics<parallel>], iteration_bounds = array<i64: 1>, scalar_prefetch = 0 : i64, scratch_operands = 0 : i64, tpu.core_type = #tpu.core_type<tc>, window_params = [{transform_indices = @transform_0, window_bounds = array<i64: 8, 16>}, {transform_indices = @transform_1, window_bounds = array<i64: 8, 16>}, {pipeline_mode = #tpu.pipeline_mode<synchronous>, transform_indices = @transform_2, window_bounds = array<i64: 16, 64>}, {pipeline_mode = #tpu.pipeline_mode<synchronous>, transform_indices = @transform_3, window_bounds = array<i64: 16, 64>}, {pipeline_mode = #tpu.pipeline_mode<synchronous>, transform_indices = @transform_4, window_bounds = array<i64: 1, 64>}, {pipeline_mode = #tpu.pipeline_mode<synchronous>, transform_indices = @transform_5, window_bounds = array<i64: 1, 64>}, {transform_indices = @transform_6, window_bounds = array<i64: 1>}, {transform_indices = @transform_7, window_bounds = array<i64: 8, 1>}]} {
    %c0 = arith.constant 0 : index
    %c0_0 = arith.constant 0 : index
    %0 = vector.load %arg1[%c0, %c0_0] : memref<8x16xf32, #tpu.memory_space<vmem>>, vector<8x16xf32>
    %c0_1 = arith.constant 0 : index
    %c0_2 = arith.constant 0 : index
    %1 = vector.load %arg2[%c0_1, %c0_2] : memref<8x16xf32, #tpu.memory_space<vmem>>, vector<8x16xf32>
    %c0_3 = arith.constant 0 : index
    %c0_4 = arith.constant 0 : index
    %2 = vector.load %arg3[%c0_3, %c0_4] : memref<16x64xf32, #tpu.memory_space<vmem>>, vector<16x64xf32>
    %cst = arith.constant dense<0.000000e+00> : vector<8x64xf32>
    %3 = tpu.matmul %0, %2, %cst {dimension_numbers = #tpu.dot_dimension_numbers<[1], [0], [0], [1], [0, 0, 1, 1], [], []>} : vector<8x16xf32>, vector<16x64xf32>, vector<8x64xf32> -> vector<8x64xf32>
    %c0_5 = arith.constant 0 : index
    %c0_6 = arith.constant 0 : index
    %4 = vector.load %arg4[%c0_5, %c0_6] : memref<16x64xf32, #tpu.memory_space<vmem>>, vector<16x64xf32>
    %cst_7 = arith.constant dense<0.000000e+00> : vector<8x64xf32>
    %5 = tpu.matmul %1, %4, %cst_7 {dimension_numbers = #tpu.dot_dimension_numbers<[1], [0], [0], [1], [0, 0, 1, 1], [], []>} : vector<8x16xf32>, vector<16x64xf32>, vector<8x64xf32> -> vector<8x64xf32>
    %6 = arith.addf %3, %5 : vector<8x64xf32>
    %c0_8 = arith.constant 0 : index
    %c0_9 = arith.constant 0 : index
    %7 = vector.load %arg5[%c0_8, %c0_9] : memref<1x64xf32, #tpu.memory_space<vmem>>, vector<1x64xf32>
    %8 = vector.broadcast %7 : vector<1x64xf32> to vector<8x64xf32>
    %9 = arith.addf %6, %8 : vector<8x64xf32>
    %cst_10 = arith.constant 0.000000e+00 : f32
    %10 = vector.broadcast %cst_10 : f32 to vector<8x64xf32>
    %11 = arith.maximumf %9, %10 : vector<8x64xf32>
    %c0_11 = arith.constant 0 : index
    %c0_12 = arith.constant 0 : index
    %12 = vector.load %arg6[%c0_11, %c0_12] : memref<1x64xf32, #tpu.memory_space<vmem>>, vector<1x64xf32>
    %13 = vector.broadcast %12 : vector<1x64xf32> to vector<8x64xf32>
    %14 = arith.mulf %11, %13 : vector<8x64xf32>
    %cst_13 = arith.constant dense<0.000000e+00> : vector<8xf32>
    %15 = vector.multi_reduction <add>, %14, %cst_13 [1] : vector<8x64xf32> to vector<8xf32>
    %16 = vector.shape_cast %15 : vector<8xf32> to vector<8x1xf32>
    %c0_14 = arith.constant 0 : index
    %17 = memref.load %arg7[%c0_14] : memref<1xf32, #tpu.memory_space<smem>>
    %18 = vector.broadcast %17 : f32 to vector<8x1xf32>
    %19 = arith.addf %16, %18 : vector<8x1xf32>
    %c0_15 = arith.constant 0 : index
    %c0_16 = arith.constant 0 : index
    %20 = vector.load %arg8[%c0_15, %c0_16] : memref<8x1xf32, #tpu.memory_space<vmem>>, vector<8x1xf32>
    tpu.vector_store %arg8[%c0_15, %c0_16], %19 {strides = array<i32>} : memref<8x1xf32, #tpu.memory_space<vmem>>, vector<8x1xf32>,
    return
  }
  func.func @transform_0(%arg0: i32) -> (i32, i32) {
    %c0_i32 = arith.constant 0 : i32
    %c0_i32_0 = arith.constant 0 : i32
    return %arg0, %c0_i32 : i32, i32
  }
  func.func @transform_1(%arg0: i32) -> (i32, i32) {
    %c0_i32 = arith.constant 0 : i32
    %c0_i32_0 = arith.constant 0 : i32
    return %arg0, %c0_i32 : i32, i32
  }
  func.func @transform_2(%arg0: i32) -> (i32, i32) {
    %c0_i32 = arith.constant 0 : i32
    %c0_i32_0 = arith.constant 0 : i32
    %c0_i32_1 = arith.constant 0 : i32
    return %c0_i32, %c0_i32_0 : i32, i32
  }
  func.func @transform_3(%arg0: i32) -> (i32, i32) {
    %c0_i32 = arith.constant 0 : i32
    %c0_i32_0 = arith.constant 0 : i32
    %c0_i32_1 = arith.constant 0 : i32
    return %c0_i32, %c0_i32_0 : i32, i32
  }
  func.func @transform_4(%arg0: i32) -> (i32, i32) {
    %c0_i32 = arith.constant 0 : i32
    %c0_i32_0 = arith.constant 0 : i32
    %c0_i32_1 = arith.constant 0 : i32
    return %c0_i32, %c0_i32_0 : i32, i32
  }
  func.func @transform_5(%arg0: i32) -> (i32, i32) {
    %c0_i32 = arith.constant 0 : i32
    %c0_i32_0 = arith.constant 0 : i32
    %c0_i32_1 = arith.constant 0 : i32
    return %c0_i32, %c0_i32_0 : i32, i32
  }
  func.func @transform_6(%arg0: i32) -> i32 {
    %c0_i32 = arith.constant 0 : i32
    %c0_i32_0 = arith.constant 0 : i32
    return %c0_i32 : i32
  }
  func.func @transform_7(%arg0: i32) -> (i32, i32) {
    %c0_i32 = arith.constant 0 : i32
    %c0_i32_0 = arith.constant 0 : i32
    return %arg0, %c0_i32 : i32, i32
  }
}

</mosaic_0001>

<bundles_post_ra>
// kernel: tpu_custom_call.1
= control target key start
LH: loop header
LB: loop body
LE: loop exit
PB: predicated region body
PF: predicated region fallthrough
CT: control target
= control target key end

     0   :  { %13 = vsyncpa [#allocation4], 0  ;;  %s506_s0 = inlined_call_operand.hbm [shape: f32[8,16], index: 0, kind: input, shape index: {}]   ;;  %s507_s1 = inlined_call_operand.hbm [shape: f32[8,16], index: 1, kind: input, shape index: {}]   ;;  %s508_s2 = inlined_call_operand.hbm [shape: f32[16,64], index: 2, kind: input, shape index: {}]   ;;  %s509_s3 = inlined_call_operand.hbm [shape: f32[16,64], index: 3, kind: input, shape index: {}]   ;;  %s510_s4 = inlined_call_operand.vmem [shape: f32[1,64], index: 4, kind: input, shape index: {}]   ;;  %s511_s5 = inlined_call_operand.vmem [shape: f32[1,64], index: 5, kind: input, shape index: {}]   ;;  %s512_s6 = inlined_call_operand.<no memory space> [shape: f32[1], index: 6, kind: input, shape index: {}]   ;;  %s513_s7 = inlined_call_operand.vmem [shape: f32[8,1], index: 7, kind: output, shape index: {}]  }
   0x1   :  { %14 = vsyncpa [#allocation6], 0 }
   0x2   :  { %15 = vsyncpa [#allocation9], 0  ;;  %s397_s24 = smov [#allocation5]   ;;  %s398_s26 = smov [#allocation3]  }
   0x3   :  { %s32_s25 = sshll.u32 %s397_s24, 4  ;;  %s22_s27 = sshll.u32 %s398_s26, 4  ;;  %s33_s25 = int_to_ptr.vmem [resolvable:$true] %s32_s25  ;;  %s23_s27 = int_to_ptr.vmem [resolvable:$true] %s22_s27 }
   0x4   :  { %s303_s30 = scalar_lea.hbm %s507_s1, 128 }
   0x5   :  { %p304_p0 = scmp.ne.s32.totalorder %s507_s1, %s303_s30  ;;  %p307_p1 = scmp.lt.u32.totalorder %s303_s30, %s507_s1 }
   0x7   :  { %p309_p2 = pnand %p307_p1, %p304_p0 }
   0x9   :  { %312 = shalt.err (!%p309_p2)
}
   0xa   :  { %s313_s12 = scalar_lea.vmem %s33_s25, 128  ;;  %p318_p4 = scmp.lt.s32.totalorder %s33_s25, %s33_s25 }
   0xb   :  { %p314_p3 = scmp.ne.s32.totalorder %s33_s25, %s313_s12  ;;  %p319_p5 = scmp.lt.s32.totalorder %s313_s12, %s313_s12 }
   0xd   :  { %p320_p6 = por %p319_p5, %p318_p4 }
   0xf   :  { %p321_p7 = pnand %p320_p6, %p314_p3 }
  0x11   :  { %324 = shalt.err (!%p321_p7)
}
  0x12   :  { %35 = dma.hbm_to_vmem [thread:$0]  %s507_s1, 128, %s33_s25, [#allocation6]  }
  0x13   :  { %s325_s17 = scalar_lea.hbm %s506_s0, 128 }
  0x14   :  { %p326_p8 = scmp.ne.s32.totalorder %s506_s0, %s325_s17  ;;  %p329_p9 = scmp.lt.u32.totalorder %s325_s17, %s506_s0 }
  0x16   :  { %p331_p10 = pnand %p329_p9, %p326_p8 }
  0x18   :  { %334 = shalt.err (!%p331_p10)
}
  0x19   :  { %s335_s22 = scalar_lea.vmem %s23_s27, 128  ;;  %p340_p12 = scmp.lt.s32.totalorder %s23_s27, %s23_s27 }
  0x1a   :  { %p336_p11 = scmp.ne.s32.totalorder %s23_s27, %s335_s22  ;;  %p341_p13 = scmp.lt.s32.totalorder %s335_s22, %s335_s22 }
  0x1c   :  { %p342_p0 = por %p341_p13, %p340_p12 }
  0x1e   :  { %p343_p1 = pnand %p342_p0, %p336_p11 }
  0x20   :  { %346 = shalt.err (!%p343_p1)
}
  0x21   :  { %25 = dma.hbm_to_vmem [thread:$0]  %s506_s0, 128, %s23_s27, [#allocation4]  }
  0x22   :  { %s399_s24 = smov [#allocation7]   ;;  %s347_s29 = scalar_lea.hbm %s508_s2, 256 }
  0x23   :  { %s41_s25 = sshll.u32 %s399_s24, 4  ;;  %p348_p2 = scmp.ne.s32.totalorder %s508_s2, %s347_s29  ;;  %s42_s25 = int_to_ptr.vmem [resolvable:$true] %s41_s25 }
  0x24   :  { %p351_p3 = scmp.lt.u32.totalorder %s347_s29, %s508_s2 }
  0x26   :  { %p353_p4 = pnand %p351_p3, %p348_p2 }
  0x28   :  { %356 = shalt.err (!%p353_p4)
}
  0x29   :  { %s357_s11 = scalar_lea.vmem %s42_s25, 256  ;;  %p362_p6 = scmp.lt.s32.totalorder %s42_s25, %s42_s25 }
  0x2a   :  { %p358_p5 = scmp.ne.s32.totalorder %s42_s25, %s357_s11  ;;  %p363_p7 = scmp.lt.s32.totalorder %s357_s11, %s357_s11 }
  0x2c   :  { %p364_p8 = por %p363_p7, %p362_p6 }
  0x2e   :  { %p365_p9 = pnand %p364_p8, %p358_p5 }
  0x30   :  { %368 = shalt.err (!%p365_p9)
}
  0x31   :  { %s400_s0 = smov 128   ;;  %s401_s27 = smov 8  }
  0x32   :  { %47 = dma.hbm_to_vmem [thread:$0]  %s508_s2, 256, %s42_s25, [#allocation6], %s400_s0, %s400_s0, %s401_s27  }
  0x33   :  { %s402_s14 = smov [#allocation8]   ;;  %s369_s18 = scalar_lea.hbm %s509_s3, 256 }
  0x34   :  { %s53_s15 = sshll.u32 %s402_s14, 4  ;;  %p370_p10 = scmp.ne.s32.totalorder %s509_s3, %s369_s18  ;;  %s54_s15 = int_to_ptr.vmem [resolvable:$true] %s53_s15 }
  0x35   :  { %p373_p11 = scmp.lt.u32.totalorder %s369_s18, %s509_s3 }
  0x37   :  { %p375_p12 = pnand %p373_p11, %p370_p10 }
  0x39   :  { %378 = shalt.err (!%p375_p12)
}
  0x3a   :  { %s379_s1 = scalar_lea.vmem %s54_s15, 256  ;;  %p384_p0 = scmp.lt.s32.totalorder %s54_s15, %s54_s15 }
  0x3b   :  { %p380_p13 = scmp.ne.s32.totalorder %s54_s15, %s379_s1  ;;  %p385_p1 = scmp.lt.s32.totalorder %s379_s1, %s379_s1 }
  0x3d   :  { %p386_p2 = por %p385_p1, %p384_p0 }
  0x3f   :  { %p387_p3 = pnand %p386_p2, %p380_p13 }
  0x41   :  { %390 = shalt.err (!%p387_p3)
}
  0x42   :  { %59 = dma.hbm_to_vmem [thread:$0]  %s509_s3, 256, %s54_s15, [#allocation9], %s400_s0, %s400_s0, %s401_s27  }
  0x43   :  { %391 = dma.done.wait [#allocation4], 128  }
  0x44   :  { %392 = vsyncadd [#allocation4], 4294967168 }
  0x45   :  { %393 = dma.done.wait [#allocation6], 384  }
  0x46   :  { %394 = vsyncadd [#allocation6], 4294966912 }
  0x47   :  { %395 = dma.done.wait [#allocation9], 256  }
  0x48   :  { %396 = vsyncadd [#allocation9], 4294967040  ;;  %v403_v0 = vmov 0.0|0.0   ;;  %vm404_vm0 = vmmov 0   ;;  %v405_v1 = vmov 0.0   ;;  %v82_v2 = vld [vmem:[#allocation8] sm:$0xff]  ;;  %v253_v21 = vstv %s512_s6 }
  0x49   :  { %288 = vmatprep.subr.bf16.mxu0 %v403_v0  ;;  %291 = vmatprep.subr.bf16.mxu1 %v403_v0  ;;  %v83_v3 = vld [vmem:[#allocation8 + $0x8] sm:$0xff]  ;;  %v80_v4 = vld [vmem:[#allocation7] sm:$0xff]  ;;  %v81_v6 = vld [vmem:[#allocation7 + $0x8] sm:$0xff]  ;;  %vm84_vm1 = vcmask 130048   ;;  %vm248_vm2 = vcmask 523264   ;;  %vm255_vm3 = vcmask 7168  }
  0x4a   :  { %278 = vmatprep.mubr.msk.f32.mxu0 %vm404_vm0, %v405_v1  ;;  %285 = vmatprep.mubr.msk.f32.mxu1 %vm404_vm0, %v405_v1  ;;  %v289_v5 = vpack.c.bf16 %v83_v3, %v82_v2  ;;  %v292_v7 = vpack.c.bf16 %v81_v6, %v80_v4  ;;  %v79_v8 = vld [vmem:[#allocation5] sm:$0xff]  ;;  %v78_v9 = vld [vmem:[#allocation3] sm:$0xff] }
  0x4b   :  { %v266_v12 = vld [vmem:[%s510_s4] ss:$0 sm:$0xff] }
  0x4c   :  { %290 = vmatpush3.bf16.msra.mxu0 %v289_v5  ;;  %293 = vmatpush3.bf16.msra.mxu1 %v292_v7  ;;  %v267_v17 = vld [vmem:[%s511_s5] ss:$0 sm:$0xff] }
  0x4f   :  { %279 = vmatmul.mubr.msk.f32.vlgmr.msra.gmra.mrb[0].mxu0 %vm84_vm1, %v79_v8  ;;  %286 = vmatmul.mubr.msk.f32.vlgmr.msra.gmra.mrb[0].mxu1 %vm84_vm1, %v78_v9 }
 0x122   :  { %v154_v10 = vpop.f32.mrb[0].mxu0  ;;  %v227_v11 = vpop.f32.mrb[0].mxu1 }
 0x123   :  { %v280_v13 = vpop.f32.mrb[1].mxu0  ;;  %v228_v14 = vadd.f32 %v227_v11, %v154_v10  ;;  %v287_v15 = vpop.f32.mrb[1].mxu1 }
 0x125   :  { %v238_v16 = vadd.f32 %v266_v12, %v228_v14 }
 0x127   :  { %v239_v18 = vmax.f32 %v238_v16, 0.0 }
 0x129   :  { %v247_v19 = vmul.f32 %v267_v17, %v239_v18 }
 0x12b   :  { %v249_v20 = vsel %vm248_vm2, %v247_v19, 0.0 }
 0x12c   :  { %250 = vadd.xlane.f32.xlu0 %v249_v20 }
 0x1b9   :  { %v251_v22 = vpop.xlane.xlu0 %250 }
 0x1ba   :  { %v254_v23 = vadd.f32 %v253_v21, %v251_v22 }
 0x1bc   :  { %256 = vst.msk [vmem:[%s513_s7] sm:$0xff] %vm255_vm3, %v254_v23 }
 0x1bd   :  { %261 = vsyncpa [#allocation4], 1 }
 0x1be   :  { %262 = vsyncpa [#allocation6], 1 }
 0x1bf   :  { %263 = vsyncpa [#allocation9], 1 }

</bundles_post_ra>
